<compile_context>
chip_gen: v5e
topology: v5e:2x2
jax: 0.10.0
libtpu: 0.0.40
codegen_flags: <defaults>
</compile_context>

<pallas_src>
import jax
import jax.numpy as jnp
from jax.experimental import pallas as pl
from jax.experimental.pallas import tpu as pltpu

_MAX_INFLIGHT_DMAS = 8          # max concurrent DMA descriptors / semaphores
_TARGET_CHUNK_BYTES = 8 << 20   # ~8 MiB per DMA chunk


def _make_hbm_copy_kernel(n_chunks, chunk_rows, rows):
    """Build an HBM->HBM chunked-DMA identity-copy kernel.

    src_ref / dst_ref live in ANY (HBM) memory space; the kernel only drives
    the DMA engine — no VMEM staging, no vector loads/stores.
    """

    def kernel(src_ref, dst_ref, sems):
        # Issue every chunk first (all DMAs in flight), then wait on all of
        # them.  Chunk geometry is static, so this unrolls at trace time.
        for c in range(n_chunks):
            start = c * chunk_rows
            size = min(chunk_rows, rows - start)
            pltpu.make_async_copy(
                src_ref.at[pl.ds(start, size)],
                dst_ref.at[pl.ds(start, size)],
                sems.at[c],
            ).start()
        for c in range(n_chunks):
            start = c * chunk_rows
            size = min(chunk_rows, rows - start)
            pltpu.make_async_copy(
                src_ref.at[pl.ds(start, size)],
                dst_ref.at[pl.ds(start, size)],
                sems.at[c],
            ).wait()

    return kernel


def _pallas_identity(x):
    """Route `x` through a pure HBM->HBM DMA identity-copy Pallas kernel."""
    if x.ndim == 0:
        # Degenerate scalar case: copy as a (1,)-shaped array.
        return _pallas_identity(x.reshape(1)).reshape(())

    rows = x.shape[0]
    itemsize = jnp.dtype(x.dtype).itemsize
    total_bytes = x.size * itemsize

    # Chunk the leading axis into ~_TARGET_CHUNK_BYTES DMAs, capped by the
    # number of available semaphore slots and by the number of rows.
    want_chunks = max(1, -(-total_bytes // _TARGET_CHUNK_BYTES))
    n_chunks = int(min(_MAX_INFLIGHT_DMAS, rows, want_chunks))
    chunk_rows = -(-rows // n_chunks)          # ceil
    n_chunks = -(-rows // chunk_rows)          # actual number of nonempty chunks

    kernel = _make_hbm_copy_kernel(n_chunks, chunk_rows, rows)

    return pl.pallas_call(
        kernel,
        out_shape=jax.ShapeDtypeStruct(x.shape, x.dtype),
        in_specs=[pl.BlockSpec(memory_space=pl.ANY)],
        out_specs=pl.BlockSpec(memory_space=pl.ANY),
        scratch_shapes=[pltpu.SemaphoreType.DMA((n_chunks,))],
        cost_estimate=pl.CostEstimate(
            flops=0, transcendentals=0, bytes_accessed=2 * total_bytes),
    )(x)


def dummy_decoder_forward(
    tgt,
    memory,
    tgt_mask=None,
    memory_mask=None,
    tgt_key_padding_mask=None,
    memory_key_padding_mask=None,
    **_,
):
    """Faithful (and fastest) translation of DummyDecoder.forward.

    The module is a pure identity on `memory`: zero FLOPs, zero HBM traffic,
    so no kernel is launched at all.  All other args are accepted and ignored,
    exactly like the PyTorch reference.  Use this path in production.
    """
    return memory


def dummy_decoder_forward_pallas(
    tgt,
    memory,
    tgt_mask=None,
    memory_mask=None,
    tgt_key_padding_mask=None,
    memory_key_padding_mask=None,
    **_,
):
    """Same semantics, routed through a pure-DMA Pallas copy kernel.

    Kept only to preserve / test a custom-call boundary; it costs a full
    2*N-byte HBM read+write that `dummy_decoder_forward` avoids entirely.
    """
    return _pallas_identity(memory)


if __name__ == "__main__":
    key = jax.random.PRNGKey(0)
    k_tgt, k_mem = jax.random.split(key)

    # Shapes consistent with nn.Transformer decoder inputs: (seq_len, batch, d_model)
    seq_len, batch, d_model = 8, 2, 32
    tgt = jax.random.normal(k_tgt, (seq_len, batch, d_model), dtype=jnp.float32)
    memory = jax.random.normal(k_mem, (seq_len, batch, d_model), dtype=jnp.float32)

    # Masks (ignored by the module, passed to match the signature).
    tgt_mask = jnp.zeros((seq_len, seq_len), dtype=jnp.float32)
    memory_mask = jnp.zeros((seq_len, seq_len), dtype=jnp.float32)
    tgt_key_padding_mask = jnp.zeros((batch, seq_len), dtype=bool)
    memory_key_padding_mask = jnp.zeros((batch, seq_len), dtype=bool)

    # Zero-cost path (the faithful translation): returns `memory` itself.
    out_fast = dummy_decoder_forward(
        tgt, memory, tgt_mask, memory_mask,
        tgt_key_padding_mask, memory_key_padding_mask,
    )
    assert out_fast is memory

    # Pallas custom-call path (pure HBM->HBM DMA identity copy).
    out = dummy_decoder_forward_pallas(
        tgt, memory, tgt_mask, memory_mask,
        tgt_key_padding_mask, memory_key_padding_mask,
    )
    out = jax.block_until_ready(out)

    assert out.shape == memory.shape
    assert out.dtype == memory.dtype
    assert bool(jnp.array_equal(out, memory))

    print("KERNEL_OK")
</pallas_src>

<mosaic_0001>
module attributes {stable_mosaic.version = 11 : i64} {
  func.func @kernel(%arg0: memref<8x2x32xf32, #tpu.memory_space<any>>, %arg1: memref<8x2x32xf32, #tpu.memory_space<any>>, %arg2: memref<1x!tpu.dma_semaphore, #tpu.memory_space<semaphore_mem>>) attributes {dimension_semantics = [], scalar_prefetch = 0 : i64, scratch_operands = 1 : i64, tpu.core_type = #tpu.core_type<tc>} {
    %c0_i32 = arith.constant 0 : i32
    %c0_i32_0 = arith.constant 0 : i32
    %c0_i32_1 = arith.constant 0 : i32
    %c0_i32_2 = arith.constant 0 : i32
    %0 = tpu.memref_slice %arg0[%c0_i32_0, %c0_i32_1, %c0_i32_2] : memref<8x2x32xf32, #tpu.memory_space<any>> -> memref<8x2x32xf32, #tpu.memory_space<any>>
    %c0_i32_3 = arith.constant 0 : i32
    %c0_i32_4 = arith.constant 0 : i32
    %c0_i32_5 = arith.constant 0 : i32
    %1 = tpu.memref_slice %arg1[%c0_i32_3, %c0_i32_4, %c0_i32_5] : memref<8x2x32xf32, #tpu.memory_space<any>> -> memref<8x2x32xf32, #tpu.memory_space<any>>
    %2 = tpu.memref_slice %arg2[%c0_i32] : memref<1x!tpu.dma_semaphore, #tpu.memory_space<semaphore_mem>> -> memref<1x!tpu.dma_semaphore, #tpu.memory_space<semaphore_mem>>
    %3 = tpu.memref_squeeze %2 : memref<1x!tpu.dma_semaphore, #tpu.memory_space<semaphore_mem>> -> memref<!tpu.dma_semaphore, #tpu.memory_space<semaphore_mem>>
    tpu.enqueue_dma source(%0 : memref<8x2x32xf32, #tpu.memory_space<any>>) target(%1 : memref<8x2x32xf32, #tpu.memory_space<any>>) target_semaphore(%3 : memref<!tpu.dma_semaphore, #tpu.memory_space<semaphore_mem>>)
    %c0_i32_6 = arith.constant 0 : i32
    %c0_i32_7 = arith.constant 0 : i32
    %c0_i32_8 = arith.constant 0 : i32
    %c0_i32_9 = arith.constant 0 : i32
    %4 = tpu.memref_slice %arg0[%c0_i32_7, %c0_i32_8, %c0_i32_9] : memref<8x2x32xf32, #tpu.memory_space<any>> -> memref<8x2x32xf32, #tpu.memory_space<any>>
    %c0_i32_10 = arith.constant 0 : i32
    %c0_i32_11 = arith.constant 0 : i32
    %c0_i32_12 = arith.constant 0 : i32
    %5 = tpu.memref_slice %arg1[%c0_i32_10, %c0_i32_11, %c0_i32_12] : memref<8x2x32xf32, #tpu.memory_space<any>> -> memref<8x2x32xf32, #tpu.memory_space<any>>
    %6 = tpu.memref_slice %arg2[%c0_i32_6] : memref<1x!tpu.dma_semaphore, #tpu.memory_space<semaphore_mem>> -> memref<1x!tpu.dma_semaphore, #tpu.memory_space<semaphore_mem>>
    %7 = tpu.memref_squeeze %6 : memref<1x!tpu.dma_semaphore, #tpu.memory_space<semaphore_mem>> -> memref<!tpu.dma_semaphore, #tpu.memory_space<semaphore_mem>>
    tpu.wait_dma2 semaphore(%7 : memref<!tpu.dma_semaphore, #tpu.memory_space<semaphore_mem>>) src(%4 : memref<8x2x32xf32, #tpu.memory_space<any>>) dst(%5 : memref<8x2x32xf32, #tpu.memory_space<any>>)
    return
  }
}

</mosaic_0001>

<bundles_post_ra>
// kernel: tpu_custom_call.1
= control target key start
LH: loop header
LB: loop body
LE: loop exit
PB: predicated region body
PF: predicated region fallthrough
CT: control target
= control target key end

     0   :  { %s33_s12 = smov [#allocation2]   ;;  %s34_s13 = smov [#allocation3]   ;;  %s52_s0 = inlined_call_operand.hbm [shape: f32[8,2,32], index: 0, kind: input, shape index: {}]   ;;  %s53_s1 = inlined_call_operand.hbm [shape: f32[8,2,32], index: 1, kind: output, shape index: {}]  }
   0x1   :  { %s10_s8 = sshll.u32 %s52_s0, 4  ;;  %s12_s11 = sshll.u32 %s53_s1, 4  ;;  %s11_s8 = int_to_ptr.hbm [resolvable:$true] %s10_s8  ;;  %s13_s11 = int_to_ptr.hbm [resolvable:$true] %s12_s11 }
   0x2   :  { %s35_s14 = smov 0  }
   0x3   :  { %16 = dma.general %s11_s8, 256, %s13_s11, %s33_s12, %s34_s13, [#allocation4], %s35_s14, 0  }
   0x4   :  { %31 = dma.done.wait [#allocation2], 256 }
   0x5   :  { %32 = vsyncadd [#allocation2], 4294967040 }
   0x6   :  { %21 = vsyncmov [#allocation2] }
   0x9   :  { %s22_s15 = vpop.sfrf %21 }
   0xa   :  { %p27_p0 = scmp.ne.s32.totalorder %s22_s15, 0 }
   0xc   :  { %26 = shalt.err (%p27_p0)  }

</bundles_post_ra>
